<compile_context>
chip_gen: v7x
topology: tpu7x:2x2x1
jax: 0.10.0
libtpu: 0.0.40
codegen_flags: <defaults>
</compile_context>

<pallas_src>
import math
import functools

import jax
import jax.numpy as jnp
from jax.experimental import pallas as pl
from jax.experimental.pallas import tpu as pltpu


# ---------------------------------------------------------------------------
# Host-side helpers
# ---------------------------------------------------------------------------

def _make_pe_table(S, D):
    """Sinusoidal PE table identical to the PyTorch buffer pe[0, :S, :D] (float32)."""
    position = jnp.arange(S, dtype=jnp.float32)[:, None]                  # (S, 1)
    div_term = jnp.exp(jnp.arange(0, D, 2, dtype=jnp.float32)
                       * (-math.log(10000.0) / D))                        # (D//2,)
    angles = position * div_term                                          # (S, D//2)
    # Interleave so pe[:, 0::2] = sin, pe[:, 1::2] = cos.
    return jnp.stack([jnp.sin(angles), jnp.cos(angles)], axis=-1).reshape(S, D)


def _lane_fold(S, D):
    """Smallest g with g | S and (D*g) % 128 == 0, so the folded feature dim is
    lane-dense (multiple of 128).  Returns 1 if D already is, or no such g exists."""
    if D % 128 == 0:
        return 1
    need = 128 // math.gcd(D, 128)          # g must be a multiple of this
    g = need
    while g <= S:
        if S % g == 0:
            return g
        g += need
    return 1


def _pick_vmem_limit():
    """Scoped-VMEM limit: 64 MiB where physical VMEM is 128 MiB (v5e/v6e), otherwise
    32 MiB (v7x has 64 MiB physical; 32 MiB scoped is the safe default)."""
    limit = 32 * 1024 * 1024
    try:
        cap = getattr(pltpu.get_tpu_info(), "vmem_capacity_bytes", None)
        if cap is not None and cap >= 128 * 1024 * 1024:
            limit = 64 * 1024 * 1024
    except Exception:
        pass
    return limit


def _choose_tiles(B, Sp, Dp, itemsize, vmem_limit):
    """Pick (TB, TS): batch rows and sequence rows per block.

    Per grid step the pipeline holds ~ 2x(in) + 2x(out) blocks in x.dtype plus 2x the
    f32 PE block:  TS*Dp*(4*TB*itemsize + 8) bytes.  Target ~75% of the scoped limit.
    """
    budget = int(vmem_limit * 0.75)
    per_row = Dp * (4 * itemsize + 8)                     # cost of one seq row at TB=1
    max_rows = max(8, budget // max(per_row, 1))
    if Sp <= max_rows:
        TS = Sp
    else:
        TS = (max_rows // 8) * 8
        # Prefer an exact divisor of Sp (no padded tail) if one exists nearby;
        # otherwise keep the big tile and let the cdiv grid mask the tail block.
        for t in range(TS, max(TS // 2, 7), -8):
            if Sp % t == 0:
                TS = t
                break
    denom = 4 * itemsize * TS * Dp
    max_tb = max(1, (budget - 8 * TS * Dp) // max(denom, 1))
    TB = 1
    for tb in range(min(B, max_tb), 0, -1):
        if B % tb == 0:
            TB = tb
            break
    return TB, TS


# ---------------------------------------------------------------------------
# Kernel
# ---------------------------------------------------------------------------

def _pe_dropout_kernel(seed_ref, x_ref, pe_ref, o_ref, *, p, training, seq_rows):
    """x_ref/o_ref: (TB, TS, Dp) in x.dtype.  pe_ref: (TS, Dp) float32."""
    # Add in f32 (PyTorch promotes against the f32 `pe` buffer); cast only at the store.
    y = x_ref[...].astype(jnp.float32) + pe_ref[...]

    if training and p > 0.0:
        TB, TS, Dp = x_ref.shape
        # Counter-based PRNG keyed on (seed, global flat element index): the mask is
        # deterministic and independent of the chosen tiling / lane fold.
        # TODO(synk): on hardware-only deployments switch to pltpu.prng_seed /
        #   pltpu.prng_random_bits (moves mask generation off the VALU critical path);
        #   kept portable here because the HW PRNG has no interpret-mode lowering.
        # TODO(synk): the uint32 flat index wraps for tensors with > 2^32 elements.
        m32 = 0xFFFFFFFF
        s0 = pl.program_id(0).astype(jnp.uint32)
        b0 = pl.program_id(1).astype(jnp.uint32)
        seed_u = seed_ref[0].astype(jnp.uint32)
        base = (b0 * jnp.uint32((TB * seq_rows * Dp) & m32)
                + s0 * jnp.uint32((TS * Dp) & m32))
        key = base + seed_u * jnp.uint32(0x9E3779B1) + jnp.uint32(0x85EBCA6B)

        tb = jax.lax.broadcasted_iota(jnp.int32, (TB, TS, Dp), 0).astype(jnp.uint32)
        ts = jax.lax.broadcasted_iota(jnp.int32, (TB, TS, Dp), 1).astype(jnp.uint32)
        cc = jax.lax.broadcasted_iota(jnp.int32, (TB, TS, Dp), 2).astype(jnp.uint32)
        off = tb * jnp.uint32((seq_rows * Dp) & m32) + ts * jnp.uint32(Dp) + cc

        h = (off + key) * jnp.uint32(0x9E3779B9)          # multiplicative hash
        h = h ^ (h >> 16)
        h = h * jnp.uint32(0x846CA68B)

        # Drop iff h < round(p * 2^32) -> keep prob = 1 - p.  Inverted-dropout scaling.
        thresh = jnp.uint32(min(int(round(p * (2.0 ** 32))), 2 ** 32 - 1))
        y = jnp.where(h >= thresh, y, 0.0) * jnp.float32(1.0 / (1.0 - p))

    o_ref[...] = y.astype(o_ref.dtype)


# ---------------------------------------------------------------------------
# Wrapper
# ---------------------------------------------------------------------------

def positional_encoding(x, *, p=0.1, training=False, seed=0, donate_x=False):
    """x: (B, S, D).  Returns x + PE (with inverted dropout when training=True)."""
    B, S, D = x.shape
    assert D % 2 == 0, "d_model must be even (same restriction as the PyTorch module)"

    # Lane-density fold: view (B, S, D) as (B, S//g, D*g) with D*g a multiple of 128.
    g = _lane_fold(S, D)
    Sp, Dp = S // g, D * g

    pe = _make_pe_table(S, D).reshape(Sp, Dp)           # (Sp, Dp) f32, tiny vs. x traffic
    xr = x.reshape(B, Sp, Dp)

    vmem_limit = _pick_vmem_limit()
    TB, TS = _choose_tiles(B, Sp, Dp, jnp.dtype(x.dtype).itemsize, vmem_limit)
    n_s = pl.cdiv(Sp, TS)
    n_b = pl.cdiv(B, TB)

    seed_arr = jnp.array([seed], dtype=jnp.int32)
    kernel = functools.partial(_pe_dropout_kernel, p=float(p),
                               training=bool(training), seq_rows=Sp)

    out = pl.pallas_call(
        kernel,
        out_shape=jax.ShapeDtypeStruct((B, Sp, Dp), x.dtype),
        grid_spec=pltpu.PrefetchScalarGridSpec(
            num_scalar_prefetch=1,                       # seed lands in SMEM
            # Batch is the innermost grid axis: the PE block index (s, 0) is constant
            # across consecutive steps, so its re-DMA is elided by the pipeline.
            grid=(n_s, n_b),
            in_specs=[
                pl.BlockSpec((TB, TS, Dp), lambda s, b, sr: (b, s, 0)),   # x tile
                pl.BlockSpec((TS, Dp),     lambda s, b, sr: (s, 0)),      # PE tile
            ],
            out_specs=pl.BlockSpec((TB, TS, Dp), lambda s, b, sr: (b, s, 0)),
        ),
        compiler_params=pltpu.CompilerParams(
            # Megacore splits the (large) sequence axis; the inner batch loop keeps
            # the same PE block resident on each core.
            dimension_semantics=("parallel", "arbitrary"),
            vmem_limit_bytes=vmem_limit,
        ),
        # x is call-arg index 1 (after the prefetched seed); reuse its HBM buffer for
        # the output when the caller can donate it.
        input_output_aliases=({1: 0} if donate_x else {}),
    )(seed_arr, xr, pe)

    return out.reshape(B, S, D)


# ---------------------------------------------------------------------------
# Reference + demo
# ---------------------------------------------------------------------------

def _reference_eval(x):
    """Pure-JAX reference of the PyTorch forward in eval mode (dropout = identity)."""
    B, S, D = x.shape
    position = jnp.arange(S, dtype=jnp.float32)[:, None]
    div_term = jnp.exp(jnp.arange(0, D, 2, dtype=jnp.float32)
                       * (-math.log(10000.0) / D))
    pe = jnp.zeros((S, D), dtype=jnp.float32)
    pe = pe.at[:, 0::2].set(jnp.sin(position * div_term))
    pe = pe.at[:, 1::2].set(jnp.cos(position * div_term))
    return x + pe[None, :, :]


def _check_shape(key, B, S, D, p=0.1):
    x = jax.random.normal(key, (B, S, D), dtype=jnp.float32)
    y_ref = _reference_eval(x)

    # Eval mode (dropout is identity) — must match the reference.
    y_eval = jax.block_until_ready(positional_encoding(x, p=p, training=False))
    assert jnp.allclose(y_eval, y_ref, atol=1e-5, rtol=1e-5), "mismatch vs reference"

    # Training mode (inverted dropout) — surviving elements equal (x + pe) / (1 - p),
    # dropped elements are exactly 0.
    y_train = jax.block_until_ready(
        positional_encoding(x, p=p, training=True, seed=1234))
    assert y_train.shape == (B, S, D)
    kept = y_train != 0
    assert jnp.allclose(jnp.where(kept, y_train, 0.0),
                        jnp.where(kept, y_ref / (1.0 - p), 0.0),
                        atol=1e-4, rtol=1e-4), "dropout scaling mismatch"


if __name__ == "__main__":
    key = jax.random.PRNGKey(0)
    k1, k2 = jax.random.split(key)

    _check_shape(k1, B=2, S=8, D=32)      # D < 128 -> exercises the lane-density fold
    _check_shape(k2, B=2, S=16, D=128)    # D multiple of 128 -> no fold

    print("KERNEL_OK")
</pallas_src>

<mosaic_0001>
module attributes {stable_mosaic.version = 11 : i64} {
  func.func @_pe_dropout_kernel(%arg0: i32, %arg1: i32, %arg2: memref<1xi32, #tpu.memory_space<smem>>, %arg3: memref<2x2x128xf32, #tpu.memory_space<vmem>>, %arg4: memref<2x128xf32, #tpu.memory_space<vmem>>, %arg5: memref<2x2x128xf32, #tpu.memory_space<vmem>>) attributes {dimension_semantics = [#tpu.dimension_semantics<parallel>, #tpu.dimension_semantics<arbitrary>], iteration_bounds = array<i64: 1, 1>, scalar_prefetch = 1 : i64, scratch_operands = 0 : i64, tpu.core_type = #tpu.core_type<tc>, window_params = [{transform_indices = @transform_0, window_bounds = array<i64: 2, 2, 128>}, {transform_indices = @transform_1, window_bounds = array<i64: 2, 128>}, {transform_indices = @transform_2, window_bounds = array<i64: 2, 2, 128>}]} {
    %c0 = arith.constant 0 : index
    %c0_0 = arith.constant 0 : index
    %c0_1 = arith.constant 0 : index
    %0 = vector.load %arg3[%c0, %c0_0, %c0_1] : memref<2x2x128xf32, #tpu.memory_space<vmem>>, vector<2x2x128xf32>
    %c0_2 = arith.constant 0 : index
    %c0_3 = arith.constant 0 : index
    %1 = vector.load %arg4[%c0_2, %c0_3] : memref<2x128xf32, #tpu.memory_space<vmem>>, vector<2x128xf32>
    %2 = vector.shape_cast %1 : vector<2x128xf32> to vector<1x2x128xf32>
    %3 = vector.broadcast %2 : vector<1x2x128xf32> to vector<2x2x128xf32>
    %4 = arith.addf %0, %3 : vector<2x2x128xf32>
    %c0_4 = arith.constant 0 : index
    %c0_5 = arith.constant 0 : index
    %c0_6 = arith.constant 0 : index
    %5 = vector.load %arg5[%c0_4, %c0_5, %c0_6] : memref<2x2x128xf32, #tpu.memory_space<vmem>>, vector<2x2x128xf32>
    tpu.vector_store %arg5[%c0_4, %c0_5, %c0_6], %4 {strides = array<i32>} : memref<2x2x128xf32, #tpu.memory_space<vmem>>, vector<2x2x128xf32>,
    return
  }
  func.func @transform_0(%arg0: i32, %arg1: i32, %arg2: memref<1xi32, #tpu.memory_space<smem>>) -> (i32, i32, i32) {
    %c0_i32 = arith.constant 0 : i32
    %c0_i32_0 = arith.constant 0 : i32
    return %arg1, %arg0, %c0_i32 : i32, i32, i32
  }
  func.func @transform_1(%arg0: i32, %arg1: i32, %arg2: memref<1xi32, #tpu.memory_space<smem>>) -> (i32, i32) {
    %c0_i32 = arith.constant 0 : i32
    %c0_i32_0 = arith.constant 0 : i32
    return %arg0, %c0_i32 : i32, i32
  }
  func.func @transform_2(%arg0: i32, %arg1: i32, %arg2: memref<1xi32, #tpu.memory_space<smem>>) -> (i32, i32, i32) {
    %c0_i32 = arith.constant 0 : i32
    %c0_i32_0 = arith.constant 0 : i32
    return %arg1, %arg0, %c0_i32 : i32, i32, i32
  }
}

</mosaic_0001>

<bundles_post_ra>
// kernel: tpu_custom_call.1
= control target key start
LH: loop header
LB: loop body
LE: loop exit
PB: predicated region body
PF: predicated region fallthrough
CT: control target
= control target key end

     0   :  { %9 = vsyncpa [#allocation5], 0  ;;  %s161_s0 = inlined_call_operand.<no memory space> [shape: s32[1], index: 0, kind: input, shape index: {}]   ;;  %s162_s1 = inlined_call_operand.hbm [shape: f32[2,2,128], index: 1, kind: input, shape index: {}]   ;;  %s163_s2 = inlined_call_operand.vmem [shape: f32[2,128], index: 2, kind: input, shape index: {}]   ;;  %s164_s3 = inlined_call_operand.hbm [shape: f32[2,2,128], index: 3, kind: output, shape index: {}]  }
   0x1   :  { %10 = vsyncpa [#allocation6], 0  ;;  %s104_s12 = smov [#allocation4]   ;;  %s56_s16 = scalar_lea.hbm %s162_s1, 64 }
   0x2   :  { %s16_s13 = sshll.u32 %s104_s12, 4  ;;  %p57_p0 = scmp.ne.s32.totalorder %s162_s1, %s56_s16  ;;  %s17_s13 = int_to_ptr.vmem [resolvable:$true] %s16_s13 }
   0x3   :  { %p60_p1 = scmp.lt.u32.totalorder %s56_s16, %s162_s1 }
   0x5   :  { %p62_p2 = pnand %p60_p1, %p57_p0 }
   0x7   :  { %65 = shalt.err (!%p62_p2)
}
   0x8   :  { %s66_s20 = scalar_lea.vmem %s17_s13, 64  ;;  %p71_p4 = scmp.lt.s32.totalorder %s17_s13, %s17_s13 }
   0x9   :  { %p67_p3 = scmp.ne.s32.totalorder %s17_s13, %s66_s20  ;;  %p72_p5 = scmp.lt.s32.totalorder %s66_s20, %s66_s20 }
   0xb   :  { %p73_p6 = por %p72_p5, %p71_p4 }
   0xd   :  { %p74_p7 = pnand %p73_p6, %p67_p3 }
   0xf   :  { %77 = shalt.err (!%p74_p7)
}
  0x10   :  { %s105_s21 = smov 32   ;;  %s106_s22 = smov 2  }
  0x11   :  { %22 = dma.hbm_to_vmem [thread:$0]  %s162_s1, 64, %s17_s13, [#allocation5], %s105_s21, %s105_s21, %s106_s22  }
  0x12   :  { %100 = dma.done.wait [#allocation5], 64  }
  0x13   :  { %101 = vsyncadd [#allocation5], 4294967232  ;;  %s107_s25 = smov [#allocation7]   ;;  %v28_v0 = vld [vmem:[#allocation4] sm:$0x3] }
  0x14   :  { %s40_s26 = sshll.u32 %s107_s25, 4  ;;  %v30_v1 = vld [vmem:[%s163_s2] sm:$0x3]  ;;  %v29_v2 = vld [vmem:[#allocation4 + $0x2] sm:$0x3]  ;;  %s41_s26 = int_to_ptr.vmem [resolvable:$true] %s40_s26 }
  0x15   :  { %v31_v3 = vadd.f32 %v30_v1, %v28_v0  ;;  %v32_v4 = vadd.f32 %v30_v1, %v29_v2  ;;  %s78_s29 = scalar_lea.vmem %s41_s26, 64  ;;  %p83_p9 = scmp.lt.s32.totalorder %s41_s26, %s41_s26 }
  0x16   :  { %p79_p8 = scmp.ne.s32.totalorder %s41_s26, %s78_s29  ;;  %p84_p10 = scmp.lt.s32.totalorder %s78_s29, %s78_s29 }
  0x17   :  { %33 = vst [vmem:[#allocation7] sm:$0x3] %v31_v3  ;;  %34 = vst [vmem:[#allocation7 + $0x2] sm:$0x3] %v32_v4 }
  0x18   :  { %p85_p11 = por %p84_p10, %p83_p9 }
  0x1a   :  { %p86_p12 = pnand %p85_p11, %p79_p8 }
  0x1c   :  { %89 = shalt.err (!%p86_p12)
}
  0x1d   :  { %s90_s4 = scalar_lea.hbm %s164_s3, 64 }
  0x1e   :  { %p91_p13 = scmp.ne.s32.totalorder %s164_s3, %s90_s4  ;;  %p94_p0 = scmp.lt.u32.totalorder %s90_s4, %s164_s3 }
  0x20   :  { %p96_p1 = pnand %p94_p0, %p91_p13 }
  0x22   :  { %99 = shalt.err (!%p96_p1)
}
  0x23   :  { %46 = dma.vmem_to_hbm [thread:$0]  %s41_s26, 64, %s164_s3, [#allocation6], %s105_s21, %s105_s21, %s106_s22  }
  0x24   :  { %102 = dma.done.wait [#allocation6], 64  }
  0x25   :  { %103 = vsyncadd [#allocation6], 4294967232 }
  0x26   :  { %50 = vsyncpa [#allocation5], 1 }
  0x27   :  { %51 = vsyncpa [#allocation6], 1 }

</bundles_post_ra>
